<compile_context>
chip_gen: v7x
topology: tpu7x:2x2x1
jax: 0.10.0
libtpu: 0.0.40
codegen_flags: <defaults>
</compile_context>

<pallas_src>
import numpy as np
import jax
import jax.numpy as jnp
from jax import lax
from jax.experimental import pallas as pl
from jax.experimental.pallas import tpu as pltpu


def _make_pool_kernel(K, pad_l, pad_r, T, U, kind):
    """Kernel over one (batch, channel-tile) block.

    x_ref  : (tC, T)                input tile, time on lanes
    o_ref  : (tC, U)                stride-1 sliding reduction, U = T - s + 1
    xp_ref : (tC, T + pad_l+pad_r)  VMEM scratch holding the replication-padded tile
    """

    def kernel(x_ref, o_ref, xp_ref):
        x = x_ref[...]                                    # (tC, T)

        # Build the replication-padded tile in VMEM scratch.
        xp_ref[:, pad_l:pad_l + T] = x
        for p in range(pad_l):                            # replicate left edge
            xp_ref[:, p:p + 1] = x[:, 0:1]
        for p in range(pad_r):                            # replicate right edge
            xp_ref[:, pad_l + T + p:pad_l + T + p + 1] = x[:, T - 1:T]

        # K-tap sliding reduction; accumulator initialized from tap 0.
        acc = xp_ref[:, 0:U]
        if kind == "avg":
            acc = acc.astype(jnp.float32)
        for k in range(1, K):
            w = xp_ref[:, k:k + U]
            if kind == "max":
                acc = jnp.maximum(acc, w)
            else:
                acc = acc + w.astype(jnp.float32)
        if kind == "avg":
            acc = acc * (1.0 / K)

        o_ref[...] = acc.astype(o_ref.dtype)

    return kernel


def pool_block(x, *, kernel_size, stride, causal, kind="max"):
    """PoolBlock.forward: x is (N, C, T) -> (N, C, floor(T / stride))."""
    if kind == "lp":
        # TODO(synk): LPPool1d branch not implemented (module's own call is broken).
        raise NotImplementedError("kind='lp' is not supported")
    assert kind in ("max", "avg")

    N, C, T = x.shape
    K, s = int(kernel_size), int(stride)
    assert K >= s >= 1 and T >= s
    if not causal:
        assert (K - s) % 2 == 0, "kernel_size - stride must be even, if non-causal"
    pad = K - s
    pad_l, pad_r = (pad, 0) if causal else (pad // 2, pad // 2)
    Tp = T + pad                     # padded length
    U = Tp - K + 1                   # number of stride-1 windows (= T - s + 1)

    # Channel tile: largest "nice" sublane-multiple divisor of C, else full C.
    tC = C
    for cand in (128, 64, 32, 16, 8):
        if C % cand == 0:
            tC = cand
            break

    itemsize = jnp.dtype(x.dtype).itemsize
    cost = pl.CostEstimate(
        flops=int(N * C * U * max(K - 1, 1)),
        transcendentals=0,
        bytes_accessed=int(N * C * (T + U) * itemsize),
    )

    kernel = _make_pool_kernel(K, pad_l, pad_r, T, U, kind)
    out_full = pl.pallas_call(
        kernel,
        out_shape=jax.ShapeDtypeStruct((N, C, U), x.dtype),
        grid=(N, C // tC),
        in_specs=[pl.BlockSpec((None, tC, T), lambda b, c: (b, c, 0))],
        out_specs=pl.BlockSpec((None, tC, U), lambda b, c: (b, c, 0)),
        scratch_shapes=[pltpu.VMEM((tC, Tp), x.dtype)],
        compiler_params=pltpu.CompilerParams(
            dimension_semantics=("parallel", "parallel")),
        cost_estimate=cost,
    )(x)

    if s > 1:
        # TODO(synk): fuse the stride-s decimation into the kernel (needs a
        # lane-strided read or a polyphase layout); done as an XLA slice for now.
        out_full = out_full[:, :, ::s]
    return out_full


def pool_block_ref(x, *, kernel_size, stride, causal, kind="max"):
    """Pure-JAX reference matching the PyTorch PoolBlock forward."""
    K, s = int(kernel_size), int(stride)
    pad = K - s
    pad_l, pad_r = (pad, 0) if causal else (pad // 2, pad // 2)
    xp = jnp.pad(x, ((0, 0), (0, 0), (pad_l, pad_r)), mode="edge")
    dims, strides = (1, 1, K), (1, 1, s)
    nopad = [(0, 0), (0, 0), (0, 0)]
    if kind == "max":
        return lax.reduce_window(xp, jnp.array(-jnp.inf, x.dtype), lax.max,
                                 dims, strides, nopad)
    else:  # avg (replication pad -> every window holds K real values)
        tot = lax.reduce_window(xp, jnp.array(0, x.dtype), lax.add,
                                dims, strides, nopad)
        return tot / K


if __name__ == "__main__":
    key = jax.random.PRNGKey(0)
    B, C, T = 2, 4, 16
    x = jax.random.normal(key, (B, C, T), dtype=jnp.float32)

    # PoolBlock(kernel_size=4, stride=2, causal=False, kind='max')
    out = jax.block_until_ready(
        pool_block(x, kernel_size=4, stride=2, causal=False, kind="max"))
    ref = jax.block_until_ready(
        pool_block_ref(x, kernel_size=4, stride=2, causal=False, kind="max"))
    assert out.shape == (B, C, T // 2), out.shape
    np.testing.assert_allclose(np.asarray(out), np.asarray(ref),
                               rtol=1e-6, atol=1e-6)

    # PoolBlock(kernel_size=3, stride=1, causal=True, kind='avg')
    out2 = jax.block_until_ready(
        pool_block(x, kernel_size=3, stride=1, causal=True, kind="avg"))
    ref2 = jax.block_until_ready(
        pool_block_ref(x, kernel_size=3, stride=1, causal=True, kind="avg"))
    assert out2.shape == (B, C, T), out2.shape
    np.testing.assert_allclose(np.asarray(out2), np.asarray(ref2),
                               rtol=1e-6, atol=1e-6)

    print("KERNEL_OK")
</pallas_src>

<mosaic_0001>
module attributes {stable_mosaic.version = 11 : i64} {
  func.func @kernel(%arg0: i32, %arg1: i32, %arg2: memref<1x4x16xf32, #tpu.memory_space<vmem>>, %arg3: memref<1x4x15xf32, #tpu.memory_space<vmem>>, %arg4: memref<4x18xf32, #tpu.memory_space<vmem>>) attributes {dimension_semantics = [#tpu.dimension_semantics<parallel>, #tpu.dimension_semantics<parallel>], iteration_bounds = array<i64: 2, 1>, scalar_prefetch = 0 : i64, scratch_operands = 1 : i64, tpu.core_type = #tpu.core_type<tc>, window_params = [{transform_indices = @transform_0, window_bounds = array<i64: 1, 4, 16>}, {transform_indices = @transform_1, window_bounds = array<i64: 1, 4, 15>}]} {
    %c0 = arith.constant 0 : index
    %c0_0 = arith.constant 0 : index
    %c0_1 = arith.constant 0 : index
    %0 = vector.load %arg2[%c0, %c0_0, %c0_1] : memref<1x4x16xf32, #tpu.memory_space<vmem>>, vector<1x4x16xf32>
    %1 = vector.shape_cast %0 : vector<1x4x16xf32> to vector<4x16xf32>
    %c0_2 = arith.constant 0 : index
    %c1 = arith.constant 1 : index
    %2 = vector.load %arg4[%c0_2, %c1] : memref<4x18xf32, #tpu.memory_space<vmem>>, vector<4x16xf32>
    tpu.vector_store %arg4[%c0_2, %c1], %1 {strides = array<i32>} : memref<4x18xf32, #tpu.memory_space<vmem>>, vector<4x16xf32>,
    %3 = vector.extract_strided_slice %1 {offsets = [0, 0], sizes = [4, 1], strides = [1, 1]} : vector<4x16xf32> to vector<4x1xf32>
    %c0_3 = arith.constant 0 : index
    %c0_4 = arith.constant 0 : index
    %4 = vector.load %arg4[%c0_3, %c0_4] : memref<4x18xf32, #tpu.memory_space<vmem>>, vector<4x1xf32>
    tpu.vector_store %arg4[%c0_3, %c0_4], %3 {strides = array<i32>} : memref<4x18xf32, #tpu.memory_space<vmem>>, vector<4x1xf32>,
    %5 = vector.extract_strided_slice %1 {offsets = [0, 15], sizes = [4, 1], strides = [1, 1]} : vector<4x16xf32> to vector<4x1xf32>
    %c0_5 = arith.constant 0 : index
    %c17 = arith.constant 17 : index
    %6 = vector.load %arg4[%c0_5, %c17] : memref<4x18xf32, #tpu.memory_space<vmem>>, vector<4x1xf32>
    tpu.vector_store %arg4[%c0_5, %c17], %5 {strides = array<i32>} : memref<4x18xf32, #tpu.memory_space<vmem>>, vector<4x1xf32>,
    %c0_6 = arith.constant 0 : index
    %c0_7 = arith.constant 0 : index
    %7 = vector.load %arg4[%c0_6, %c0_7] : memref<4x18xf32, #tpu.memory_space<vmem>>, vector<4x15xf32>
    %c0_8 = arith.constant 0 : index
    %c1_9 = arith.constant 1 : index
    %8 = vector.load %arg4[%c0_8, %c1_9] : memref<4x18xf32, #tpu.memory_space<vmem>>, vector<4x15xf32>
    %9 = arith.maximumf %7, %8 : vector<4x15xf32>
    %c0_10 = arith.constant 0 : index
    %c2 = arith.constant 2 : index
    %10 = vector.load %arg4[%c0_10, %c2] : memref<4x18xf32, #tpu.memory_space<vmem>>, vector<4x15xf32>
    %11 = arith.maximumf %9, %10 : vector<4x15xf32>
    %c0_11 = arith.constant 0 : index
    %c3 = arith.constant 3 : index
    %12 = vector.load %arg4[%c0_11, %c3] : memref<4x18xf32, #tpu.memory_space<vmem>>, vector<4x15xf32>
    %13 = arith.maximumf %11, %12 : vector<4x15xf32>
    %c0_12 = arith.constant 0 : index
    %c0_13 = arith.constant 0 : index
    %c0_14 = arith.constant 0 : index
    %14 = vector.load %arg3[%c0_12, %c0_13, %c0_14] : memref<1x4x15xf32, #tpu.memory_space<vmem>>, vector<1x4x15xf32>
    %15 = vector.shape_cast %14 : vector<1x4x15xf32> to vector<4x15xf32>
    %16 = vector.shape_cast %13 : vector<4x15xf32> to vector<1x4x15xf32>
    tpu.vector_store %arg3[%c0_12, %c0_13, %c0_14], %16 {strides = array<i32>} : memref<1x4x15xf32, #tpu.memory_space<vmem>>, vector<1x4x15xf32>,
    return
  }
  func.func @transform_0(%arg0: i32, %arg1: i32) -> (i32, i32, i32) {
    %c0_i32 = arith.constant 0 : i32
    %c0_i32_0 = arith.constant 0 : i32
    return %arg0, %arg1, %c0_i32 : i32, i32, i32
  }
  func.func @transform_1(%arg0: i32, %arg1: i32) -> (i32, i32, i32) {
    %c0_i32 = arith.constant 0 : i32
    %c0_i32_0 = arith.constant 0 : i32
    return %arg0, %arg1, %c0_i32 : i32, i32, i32
  }
}

</mosaic_0001>

<bundles_post_ra>
// kernel: tpu_custom_call.1
= control target key start
LH: loop header
LB: loop body
LE: loop exit
PB: predicated region body
PF: predicated region fallthrough
CT: control target
= control target key end

     0   :  { %6 = vsyncpa [#allocation4], 0  ;;  %s657_s0 = inlined_call_operand.hbm [shape: f32[2,4,16], index: 0, kind: input, shape index: {}]   ;;  %s658_s1 = inlined_call_operand.hbm [shape: f32[2,4,15], index: 1, kind: output, shape index: {}]  }
   0x1   :  { %8 = vsyncpa [#allocation4 + $0x1], 0 }
   0x2   :  { %9 = vsyncpa [#allocation5], 0 }
   0x3   :  { %11 = vsyncpa [#allocation5 + $0x1], 0  ;;  %s485_s6 = smov 0   ;;  %s487_s7 = smov 0  }
   0x4   :  { %s489_s8 = smov 0   ;;  %s491_s9 = smov 0  }
   0x5   :  { %s493_s10 = smov 0   ;;  %s495_s11 = smov 0  }
   0x6 LB: > { %s274_s12 = sadd.s32 4294967295, %s466_s11   ;;  %s275_s13 = sadd.s32 4294967294, %s466_s11   ;;  %s466_s11 = sphi %s495_s11, %s17_s11   ;;  %s462_s10 = sphi %s493_s10, %s674_s10   ;;  %s458_s9 = sphi %s491_s9, %s673_s9   ;;  %s454_s8 = sphi %s489_s8, %s672_s8   ;;  %s450_s7 = sphi %s487_s7, %s671_s7   ;;  %s446_s6 = sphi %s485_s6, %s670_s6  }
   0x7   : > { %s29_s14 = sadd.s32 1, %s462_s10  ;;  %s38_s15 = sadd.s32 1, %s454_s8 }
   0x8   : > { %p31_p0 = scmp.ge.s32.totalorder %s29_s14, 2  ;;  %p45_p1 = scmp.ne.s32.totalorder %s454_s8, %s450_s7 }
   0x9   : > { %p46_p2 = scmp.eq.s32.totalorder %s466_s11, 0  ;;  %p51_p3 = scmp.ne.s32.totalorder %s450_s7, %s446_s6 }
   0xa   : > { %s676_s14 = smov (%p31_p0, %s29_s14), 0  ;;  %p52_p5 = scmp.eq.s32.totalorder %s274_s12, 0 }
   0xb   : > { %p526_p4 = por %p46_p2, %p45_p1  ;;  %s33_s17 = ssub.s32 %s462_s10, %s676_s14 }
   0xc   : > { %p77_p6 = scmp.eq.s32.totalorder %s274_s12, 1  ;;  %p36_p7 = scmp.eq.s32.totalorder %s33_s17, 0 }
   0xd   : > { %p532_p8 = por %p52_p5, %p51_p3  ;;  %p83_p10 = scmp.eq.s32.totalorder %s275_s13, 1 }
   0xe   : > { %p536_p9 = por %p77_p6, %p45_p1  ;;  %p299_p13 = scmp.lt.s32.totalorder %s466_s11, 2 }
   0xf   : > { %s541_s20 = scalar_select %p36_p7, %s454_s8, %s38_s15  }
  0x10   : > { %s662_s19 = scalar_select %p536_p9, 1, 0 }
  0x11   : > { %p543_p11 = por %p83_p10, %p51_p3  ;;  %s103_s22 = sand.u32 1, %s454_s8  }
  0x12   : > { %s278_s23 = sshll.u32 %s103_s22, 2  ;;  %s279_s24 = sshll.u32 %s462_s10, 6 }
  0x13   : > { %s663_s21 = scalar_select %p543_p11, 1, 0 }
  0x14   : > { %s554_s27 = scalar_lea.hbm %s657_s0, %s279_s24  ;;  %s107_s28 = scalar_lea.vmem [#allocation3], %s278_s23 }
  0x15   : > { %s115_s29 = sshll.u32 %s107_s28, 4  ;;  %p560_p0 = pnand %p299_p13, %p526_p4  ;;  %s556_s29 = int_to_ptr.vmem [resolvable:$true] %s115_s29 }
  0x16   : > { %s104_s2 = scalar_lea.sflag [#allocation4], %s103_s22  ;;  %s354_s3 = scalar_lea.hbm %s554_s27, 64 }
  0x17   : > { %p355_p3 = scmp.ne.s32.totalorder %s554_s27, %s354_s3  ;;  %p356_p5 = pneg %p560_p0 }
  0x18   : > { %s359_s12 = scalar_lea.hbm %s657_s0, 128  ;;  %p360_p4 = scmp.lt.u32.totalorder %s554_s27, %s657_s0 }
  0x19   : > { %p357_p6 = pnand %p356_p5, %p355_p3  ;;  %p361_p10 = scmp.lt.u32.totalorder %s359_s12, %s354_s3 }
  0x1a   : > { %p363_p12 = scmp.lt.u32.totalorder %s354_s3, %s554_s27 }
  0x1b   : > { %p358_p7 = pneg %p357_p6  ;;  %p362_p13 = por %p361_p10, %p360_p4 }
  0x1d   : > { %p364_p1 = por %p363_p12, %p362_p13 }
  0x1f   : > { %p365_p2 = pnand %p364_p1, %p358_p7 }
  0x21   : > { %368 = shalt.err (!%p365_p2)
}
  0x22   : > { %s369_s16 = scalar_lea.vmem %s556_s29, 64  ;;  %s468_s17 = smov [#allocation3]  }
  0x23   : > { %p370_p3 = scmp.ne.s32.totalorder %s556_s29, %s369_s16  ;;  %s374_s22 = sshll.u32 %s468_s17, 4  ;;  %s375_s22 = int_to_ptr.vmem [resolvable:$false] %s374_s22 }
  0x24   : > { %s376_s23 = scalar_lea.vmem %s375_s22, 128  ;;  %p377_p9 = scmp.lt.s32.totalorder %s556_s29, %s375_s22 }
  0x25   : > { %p372_p6 = pnand %p370_p3, %p356_p5  ;;  %p378_p4 = scmp.lt.s32.totalorder %s376_s23, %s369_s16 }
  0x27   : > { %p373_p11 = pneg %p372_p6  ;;  %p379_p10 = por %p378_p4, %p377_p9 }
  0x29   : > { %p380_p12 = pnand %p379_p10, %p373_p11 }
  0x2b   : > { %383 = shalt.err (!%p380_p12)
}
  0x2c   : > { %294 = dma.hbm_to_vmem [thread:$0]  (!%p560_p0), %s554_s27, 64, %s556_s29, %s104_s2  }
  0x2d   : > { %p665_p1 = scmp.lt.s32.totalorder %s466_s11, 3  ;;  %p666_p2 = scmp.ge.s32.totalorder %s466_s11, 1 }
  0x2f   : > { %p121_p5 = pnand %p666_p2, %p665_p1 }
  0x30   : > { %s596_s24 = sand.u32 (!%p121_p5), 1, %s450_s7  }
  0x31   : > { %124 = sbr.rel (%p121_p5) target bundleno = 322 (0x142), region = 24  ;;  %s281_s25 = sshll.u32 (!%p121_p5), %s596_s24, 2 }
  0x32   : > { %s127_s26 = scalar_lea.sflag (!%p121_p5), [#allocation4], %s596_s24  ;;  %s130_s28 = scalar_lea.vmem (!%p121_p5), [#allocation3], %s281_s25 }
  0x38   : > { %437 = dma.done.wait (%p532_p8), %s127_s26, 64  }
  0x39   : > { %439 = vsyncadd (%p532_p8), %s127_s26, 4294967232  ;;  %v149_v0 = vld [vmem:[%s130_s28] sm:$0xf]  ;;  %s469_s27 = smov 1   ;;  %s470_s29 = smov 2   ;;  %vm154_vm0 = vcmask 134152  }
  0x3a   : > { %151 = vrot.lane.b32.xlu0 %v149_v0, %s469_s27  ;;  %vm156_vm1 = vcmask 3072   ;;  %vm161_vm2 = vcmask 142472   ;;  %s471_s30 = smov 125   ;;  %s472_s2 = smov 127   ;;  %vm177_vm3 = vcmask 117760  }
  0x3b   : > { %s473_s18 = smov 126   ;;  %s284_s3 = sshll.u32 %s458_s9, 6 }
  0x3c   : > { %s148_s4 = scalar_lea.vmem [#allocation6], %s281_s25  ;;  %s608_s15 = scalar_lea.hbm %s658_s1, %s284_s3 }
  0x3d   : > { %s194_s5 = sshll.u32 %s148_s4, 4  ;;  %s180_s16 = scalar_lea.sflag [#allocation5], %s596_s24  ;;  %s610_s5 = int_to_ptr.vmem [resolvable:$true] %s194_s5 }
  0x3e   : > { %158 = vrot.lane.b32.xlu0 %v149_v0, %s470_s29  ;;  %s384_s17 = scalar_lea.vmem %s610_s5, 64  ;;  %p667_p9 = scmp.ne.s32.totalorder %s662_s19, 0 }
  0x3f   : > { %p385_p8 = scmp.ne.s32.totalorder %s610_s5, %s384_s17  ;;  %s474_s9 = smov [#allocation6]  }
  0x40   : > { %s388_s22 = sshll.u32 %s474_s9, 4  ;;  %s389_s22 = int_to_ptr.vmem [resolvable:$false] %s388_s22 }
  0x41   : > { %p386_p11 = pnand %p385_p8, %p667_p9  ;;  %s390_s23 = scalar_lea.vmem %s389_s22, 128 }
  0x42   : > { %p391_p7 = scmp.lt.s32.totalorder %s610_s5, %s389_s22  ;;  %p392_p13 = scmp.lt.s32.totalorder %s390_s23, %s384_s17 }
  0x43   : > { %p387_p0 = pneg %p386_p11 }
  0x44   : > { %p393_p3 = por %p392_p13, %p391_p7 }
  0x46   : > { %p394_p6 = pnand %p393_p3, %p387_p0 }
  0xac   : > { %v152_v1 = vpop.permute.xlu0 %151 }
  0xad   : > { %155 = vst.msk [vmem:[#allocation2] sm:$0xf] %vm154_vm0, %v152_v1 }
  0xae   : > { %157 = vst.msk [vmem:[#allocation2] sm:$0xf] %vm156_vm1, %v149_v0 }
  0xb0   : > { %v159_v2 = vpop.permute.xlu0 %158 }
  0xb1   : > { %162 = vst.msk [vmem:[#allocation2] sm:$0xf] %vm161_vm2, %v159_v2 }
  0xb8   : > { %v163_v3 = vld [vmem:[#allocation2] sm:$0xf] }
  0xb9   : > { %173 = vrot.lane.b32.xlu0 %v163_v3, %s471_s30  ;;  %165 = vrot.lane.b32.xlu1 %v163_v3, %s472_s2 }
  0xbd   : > { %169 = vrot.lane.b32.xlu1 %v163_v3, %s473_s18 }
 0x12b   : > { %v166_v4 = vpop.permute.xlu1 %165  ;;  %v174_v8 = vpop.permute.xlu0 %173 }
 0x12c   : > { %v168_v5 = vmax.f32 %v163_v3, %v166_v4 }
 0x12f   : > { %v170_v6 = vpop.permute.xlu1 %169 }
 0x130   : > { %v172_v7 = vmax.f32 %v168_v5, %v170_v6 }
 0x132   : > { %v176_v9 = vmax.f32 %v172_v7, %v174_v8 }
 0x134   : > { %178 = vst.msk [vmem:[%s148_s4] sm:$0xf] %vm177_vm3, %v176_v9 }
 0x135   : > { %397 = shalt.err (!%p394_p6)
}
 0x136   : > { %s398_s24 = scalar_lea.hbm %s608_s15, 64  ;;  %s402_s28 = scalar_lea.hbm %s658_s1, 128 }
 0x137   : > { %p399_p4 = scmp.ne.s32.totalorder %s608_s15, %s398_s24  ;;  %p403_p1 = scmp.lt.u32.totalorder %s608_s15, %s658_s1 }
 0x138   : > { %p404_p2 = scmp.lt.u32.totalorder %s402_s28, %s398_s24  ;;  %p406_p8 = scmp.lt.u32.totalorder %s398_s24, %s608_s15 }
 0x139   : > { %p400_p10 = pnand %p399_p4, %p667_p9 }
 0x13a   : > { %p405_p5 = por %p404_p2, %p403_p1 }
 0x13b   : > { %p401_p12 = pneg %p400_p10 }
 0x13c   : > { %p407_p11 = por %p406_p8, %p405_p5 }
 0x13e   : > { %p408_p0 = pnand %p407_p11, %p401_p12 }
 0x140   : > { %411 = shalt.err (!%p408_p0)
}
 0x141   : > { %289 = dma.vmem_to_hbm [thread:$0]  (%p667_p9), %s610_s5, 64, %s608_s15, %s180_s16  }
 0x142 PF: > { %s206_s30 = sand.u32 1, %s446_s6   ;;  %p668_p7 = scmp.ne.s32.totalorder %s663_s21, 0 }
 0x143   : > { %p669_p13 = scmp.ge.s32.totalorder %s466_s11, 2  ;;  %s207_s2 = scalar_lea.sflag [#allocation5], %s206_s30 }
 0x145   : > { %p296_p3 = pnand %p669_p13, %p668_p7 }
 0x147   : > { %441 = dma.done.wait (!%p296_p3), %s207_s2, 64  }
 0x148   : > { %443 = vsyncadd (!%p296_p3), %s207_s2, 4294967232  ;;  %s17_s11 = sadd.s32 1, %s466_s11   ;;  %s670_s6 = smov %s450_s7 }
 0x149   : > { %p14_p6 = scmp.ge.s32.totalorder %s17_s11, 4   ;;  %s671_s7 = smov %s454_s8 }
 0x14a   : > { %s672_s8 = smov %s541_s20  ;;  %s673_s9 = smov %s462_s10 }
 0x14b   : > { %s674_s10 = smov %s676_s14  ;;  %16 = sbr.rel (!%p14_p6) target bundleno = 6 (0x6), region = 69 }
 0x152   :  { %212 = vsyncpa [#allocation4], 1 }
 0x153   :  { %214 = vsyncpa [#allocation4 + $0x1], 1 }
 0x154   :  { %215 = vsyncpa [#allocation5], 1 }
 0x155   :  { %217 = vsyncpa [#allocation5 + $0x1], 1 }

</bundles_post_ra>
